<compile_context>
chip_gen: v6e
topology: v6e:2x2x1
jax: 0.10.0
libtpu: 0.0.40
codegen_flags: <defaults>
</compile_context>

<pallas_src>
import jax
import jax.numpy as jnp
from jax.experimental import pallas as pl
from jax.experimental.pallas import tpu as pltpu

EPS = 1e-6


def addnorm_kernel(x_ref, w_ref, p_ref, o_ref):
    # x_ref: (TM, D)   w_ref: (D, D)   p_ref: (3, D) = [bias; gamma; beta]   o_ref: (TM, D)
    x = x_ref[...]          # native dtype (f32 or bf16) -> fed straight to the MXU
    w = w_ref[...]

    # --- sublayer: Linear(d_model, d_model), f32 accumulation on the MXU ---
    sub = jnp.dot(x, w, preferred_element_type=jnp.float32)

    bias = p_ref[0:1, :].astype(jnp.float32)
    gamma = p_ref[1:2, :].astype(jnp.float32)
    beta = p_ref[2:3, :].astype(jnp.float32)

    # --- residual add (f32) ---
    z = sub + bias + x.astype(jnp.float32)

    # --- kospeech LayerNorm: UNBIASED std (D-1), eps added to std (not var) ---
    d = z.shape[-1]
    mean = jnp.mean(z, axis=-1, keepdims=True)
    diff = z - mean
    var_unbiased = jnp.sum(diff * diff, axis=-1, keepdims=True) / (d - 1)
    std = jnp.sqrt(var_unbiased)
    # Hoisted per-row reciprocal (one per row, not a per-element divide).
    # approx=False preserves the 1e-4 accuracy contract; flip to approx=True
    # to move it onto the otherwise-idle EUP slot if tolerance allows.
    inv = pl.reciprocal(std + EPS, approx=False)
    out = gamma * (diff * inv) + beta

    o_ref[...] = out.astype(o_ref.dtype)


def _round_up(n: int, m: int) -> int:
    return ((n + m - 1) // m) * m


def add_norm(x, w, b, gamma, beta, *, tm=512):
    """x: (B, S, D). Returns LayerNorm(x @ w + b + x) with kospeech semantics."""
    B, S, D = x.shape
    assert D % 128 == 0, "d_model must be a multiple of 128"
    rows = B * S

    # Adaptive row tile: large tiles amortize the ~0.35us/step overhead and keep
    # the MXU fed, but don't pad tiny inputs all the way up to 512 rows.
    tm_eff = min(_round_up(tm, 8), _round_up(rows, 8))
    rows_p = _round_up(rows, tm_eff)
    grid = rows_p // tm_eff

    x2 = x.reshape(rows, D)
    if rows_p != rows:
        x2 = jnp.pad(x2, ((0, rows_p - rows), (0, 0)))

    # bias / gamma / beta -> one packed (3, D) resident operand (single DMA).
    params = jnp.concatenate(
        [b.reshape(1, D), gamma.reshape(1, D), beta.reshape(1, D)], axis=0
    ).astype(jnp.float32)

    x_item = jnp.dtype(x.dtype).itemsize
    w_item = jnp.dtype(w.dtype).itemsize

    # Explicit VMEM budget: double-buffered x/out tiles + resident weight + params,
    # with headroom, clamped to 48 MiB so it is safe on v7x's 64 MiB VMEM.
    vmem_bytes = (
        2 * 2 * tm_eff * D * x_item      # x tile + out tile, double-buffered
        + 2 * D * D * w_item             # weight block
        + 2 * 3 * D * 4                  # packed params
        + (2 << 20)                      # headroom for f32 intermediates
    )
    vmem_limit = int(min(max(vmem_bytes, 16 << 20), 48 << 20))

    cost = pl.CostEstimate(
        flops=2 * rows_p * D * D + 10 * rows_p * D,
        transcendentals=rows_p,          # ~one sqrt + recip per row
        bytes_accessed=2 * rows_p * D * x_item + D * D * w_item + 3 * D * 4,
    )

    out = pl.pallas_call(
        addnorm_kernel,
        out_shape=jax.ShapeDtypeStruct((rows_p, D), x.dtype),
        grid_spec=pltpu.PrefetchScalarGridSpec(
            num_scalar_prefetch=0,
            grid=(grid,),
            in_specs=[
                pl.BlockSpec((tm_eff, D), lambda i: (i, 0)),  # x row tile (streamed)
                pl.BlockSpec((D, D), lambda i: (0, 0)),       # resident weight
                pl.BlockSpec((3, D), lambda i: (0, 0)),       # [bias; gamma; beta]
            ],
            out_specs=pl.BlockSpec((tm_eff, D), lambda i: (i, 0)),
        ),
        compiler_params=pltpu.CompilerParams(
            dimension_semantics=("parallel",),   # row axis shards across TCs (v7x)
            vmem_limit_bytes=vmem_limit,
        ),
        cost_estimate=cost,
    )(x2, w, params)

    if rows_p != rows:
        out = out[:rows]
    return out.reshape(B, S, D)


def add_norm_ref(x, w, b, gamma, beta):
    """Pure-JAX f32 reference mirroring the PyTorch forward."""
    x = x.astype(jnp.float32)
    w = w.astype(jnp.float32)
    z = jnp.einsum("bsd,de->bse", x, w) + b.reshape(-1) + x
    mean = jnp.mean(z, axis=-1, keepdims=True)
    diff = z - mean
    std = jnp.sqrt(jnp.sum(diff * diff, axis=-1, keepdims=True) / (z.shape[-1] - 1))
    return gamma.reshape(-1) * (diff / (std + EPS)) + beta.reshape(-1)


if __name__ == "__main__":
    B, S, D = 2, 8, 128   # small shapes; d_model = 128

    key = jax.random.PRNGKey(0)
    kx, kw, kb = jax.random.split(key, 3)

    x = jax.random.normal(kx, (B, S, D), dtype=jnp.float32)
    # Deterministic synthetic parameters (sublayer = Linear(d_model, d_model)).
    w = jax.random.normal(kw, (D, D), dtype=jnp.float32) * (1.0 / jnp.sqrt(D))
    b = jax.random.normal(kb, (1, D), dtype=jnp.float32) * 0.01
    gamma = jnp.ones((1, D), dtype=jnp.float32)   # LayerNorm.gamma init = ones
    beta = jnp.zeros((1, D), dtype=jnp.float32)   # LayerNorm.beta  init = zeros

    # f32 path (primary correctness check, 1e-4 tolerance)
    out = jax.block_until_ready(add_norm(x, w, b, gamma, beta))
    ref = add_norm_ref(x, w, b, gamma, beta)
    assert jnp.allclose(out, ref, atol=1e-4, rtol=1e-4), "f32 mismatch vs reference"

    # bf16 I/O path (halves HBM traffic; LayerNorm / accumulator math stays f32)
    xb, wb, bb = x.astype(jnp.bfloat16), w.astype(jnp.bfloat16), b.astype(jnp.bfloat16)
    out_bf16 = jax.block_until_ready(add_norm(xb, wb, bb, gamma, beta))
    ref_bf16 = add_norm_ref(xb, wb, bb, gamma, beta)
    assert jnp.allclose(out_bf16.astype(jnp.float32), ref_bf16,
                        atol=5e-2, rtol=5e-2), "bf16 mismatch vs reference"

    print("KERNEL_OK")
</pallas_src>

<mosaic_0001>
module attributes {stable_mosaic.version = 11 : i64} {
  func.func @addnorm_kernel(%arg0: i32, %arg1: memref<16x128xf32, #tpu.memory_space<vmem>>, %arg2: memref<128x128xf32, #tpu.memory_space<vmem>>, %arg3: memref<3x128xf32, #tpu.memory_space<vmem>>, %arg4: memref<16x128xf32, #tpu.memory_space<vmem>>) attributes {dimension_semantics = [#tpu.dimension_semantics<parallel>], iteration_bounds = array<i64: 1>, scalar_prefetch = 0 : i64, scratch_operands = 0 : i64, tpu.core_type = #tpu.core_type<tc>, window_params = [{transform_indices = @transform_0, window_bounds = array<i64: 16, 128>}, {pipeline_mode = #tpu.pipeline_mode<synchronous>, transform_indices = @transform_1, window_bounds = array<i64: 128, 128>}, {pipeline_mode = #tpu.pipeline_mode<synchronous>, transform_indices = @transform_2, window_bounds = array<i64: 3, 128>}, {transform_indices = @transform_3, window_bounds = array<i64: 16, 128>}]} {
    %c0 = arith.constant 0 : index
    %c0_0 = arith.constant 0 : index
    %0 = vector.load %arg1[%c0, %c0_0] : memref<16x128xf32, #tpu.memory_space<vmem>>, vector<16x128xf32>
    %c0_1 = arith.constant 0 : index
    %c0_2 = arith.constant 0 : index
    %1 = vector.load %arg2[%c0_1, %c0_2] : memref<128x128xf32, #tpu.memory_space<vmem>>, vector<128x128xf32>
    %cst = arith.constant dense<0.000000e+00> : vector<16x128xf32>
    %2 = tpu.matmul %0, %1, %cst {dimension_numbers = #tpu.dot_dimension_numbers<[1], [0], [0], [1], [0, 0, 1, 1], [], []>} : vector<16x128xf32>, vector<128x128xf32>, vector<16x128xf32> -> vector<16x128xf32>
    %c0_3 = arith.constant 0 : index
    %c0_4 = arith.constant 0 : index
    %3 = vector.load %arg3[%c0_3, %c0_4] : memref<3x128xf32, #tpu.memory_space<vmem>>, vector<1x128xf32>
    %c1 = arith.constant 1 : index
    %c0_5 = arith.constant 0 : index
    %4 = vector.load %arg3[%c1, %c0_5] : memref<3x128xf32, #tpu.memory_space<vmem>>, vector<1x128xf32>
    %c2 = arith.constant 2 : index
    %c0_6 = arith.constant 0 : index
    %5 = vector.load %arg3[%c2, %c0_6] : memref<3x128xf32, #tpu.memory_space<vmem>>, vector<1x128xf32>
    %6 = vector.broadcast %3 : vector<1x128xf32> to vector<16x128xf32>
    %7 = arith.addf %2, %6 : vector<16x128xf32>
    %8 = arith.addf %7, %0 : vector<16x128xf32>
    %cst_7 = arith.constant dense<0.000000e+00> : vector<16xf32>
    %9 = vector.multi_reduction <add>, %8, %cst_7 [1] : vector<16x128xf32> to vector<16xf32>
    %10 = vector.shape_cast %9 : vector<16xf32> to vector<16x1xf32>
    %cst_8 = arith.constant 1.280000e+02 : f32
    %11 = vector.broadcast %cst_8 : f32 to vector<16x1xf32>
    %12 = arith.divf %10, %11 : vector<16x1xf32>
    %13 = vector.broadcast %12 : vector<16x1xf32> to vector<16x128xf32>
    %14 = arith.subf %8, %13 : vector<16x128xf32>
    %15 = arith.mulf %14, %14 : vector<16x128xf32>
    %cst_9 = arith.constant dense<0.000000e+00> : vector<16xf32>
    %16 = vector.multi_reduction <add>, %15, %cst_9 [1] : vector<16x128xf32> to vector<16xf32>
    %17 = vector.shape_cast %16 : vector<16xf32> to vector<16x1xf32>
    %cst_10 = arith.constant 1.270000e+02 : f32
    %18 = vector.broadcast %cst_10 : f32 to vector<16x1xf32>
    %19 = arith.divf %17, %18 : vector<16x1xf32>
    %20 = math.sqrt %19 : vector<16x1xf32>
    %cst_11 = arith.constant 9.99999997E-7 : f32
    %21 = vector.broadcast %cst_11 : f32 to vector<16x1xf32>
    %22 = arith.addf %20, %21 : vector<16x1xf32>
    %23 = tpu.reciprocal %22 : vector<16x1xf32> -> vector<16x1xf32>
    %24 = vector.broadcast %23 : vector<16x1xf32> to vector<16x128xf32>
    %25 = arith.mulf %14, %24 : vector<16x128xf32>
    %26 = vector.broadcast %4 : vector<1x128xf32> to vector<16x128xf32>
    %27 = arith.mulf %26, %25 : vector<16x128xf32>
    %28 = vector.broadcast %5 : vector<1x128xf32> to vector<16x128xf32>
    %29 = arith.addf %27, %28 : vector<16x128xf32>
    %c0_12 = arith.constant 0 : index
    %c0_13 = arith.constant 0 : index
    %30 = vector.load %arg4[%c0_12, %c0_13] : memref<16x128xf32, #tpu.memory_space<vmem>>, vector<16x128xf32>
    tpu.vector_store %arg4[%c0_12, %c0_13], %29 {strides = array<i32>} : memref<16x128xf32, #tpu.memory_space<vmem>>, vector<16x128xf32>,
    return
  }
  func.func @transform_0(%arg0: i32) -> (i32, i32) {
    %c0_i32 = arith.constant 0 : i32
    %c0_i32_0 = arith.constant 0 : i32
    return %arg0, %c0_i32 : i32, i32
  }
  func.func @transform_1(%arg0: i32) -> (i32, i32) {
    %c0_i32 = arith.constant 0 : i32
    %c0_i32_0 = arith.constant 0 : i32
    %c0_i32_1 = arith.constant 0 : i32
    return %c0_i32, %c0_i32_0 : i32, i32
  }
  func.func @transform_2(%arg0: i32) -> (i32, i32) {
    %c0_i32 = arith.constant 0 : i32
    %c0_i32_0 = arith.constant 0 : i32
    %c0_i32_1 = arith.constant 0 : i32
    return %c0_i32, %c0_i32_0 : i32, i32
  }
  func.func @transform_3(%arg0: i32) -> (i32, i32) {
    %c0_i32 = arith.constant 0 : i32
    %c0_i32_0 = arith.constant 0 : i32
    return %arg0, %c0_i32 : i32, i32
  }
}

</mosaic_0001>

<bundles_post_ra>
// kernel: tpu_custom_call.1
= control target key start
LH: loop header
LB: loop body
LE: loop exit
PB: predicated region body
PF: predicated region fallthrough
CT: control target
= control target key end

     0   :  { %8 = vsyncpa [#allocation3], 0  ;;  %s429_s0 = inlined_call_operand.hbm [shape: f32[16,128], index: 0, kind: input, shape index: {}]   ;;  %s430_s1 = inlined_call_operand.hbm [shape: f32[128,128], index: 1, kind: input, shape index: {}]   ;;  %s431_s2 = inlined_call_operand.hbm [shape: f32[3,128], index: 2, kind: input, shape index: {}]   ;;  %s432_s3 = inlined_call_operand.hbm [shape: f32[16,128], index: 3, kind: output, shape index: {}]  }
   0x1   :  { %9 = vsyncpa [#allocation6], 0 }
   0x2   :  { %10 = vsyncpa [#allocation4], 0  ;;  %s382_s12 = smov [#allocation5]   ;;  %s383_s14 = smov [#allocation2]  }
   0x3   :  { %s28_s13 = sshll.u32 %s382_s12, 4  ;;  %s16_s15 = sshll.u32 %s383_s14, 4  ;;  %s29_s13 = int_to_ptr.vmem [resolvable:$true] %s28_s13  ;;  %s17_s15 = int_to_ptr.vmem [resolvable:$true] %s16_s15 }
   0x4   :  { %s304_s16 = scalar_lea.vmem %s29_s13, 2048  ;;  %p309_p1 = scmp.lt.s32.totalorder %s29_s13, %s29_s13 }
   0x5   :  { %p305_p0 = scmp.ne.s32.totalorder %s29_s13, %s304_s16  ;;  %p310_p2 = scmp.lt.s32.totalorder %s304_s16, %s304_s16 }
   0x7   :  { %p311_p3 = por %p310_p2, %p309_p1 }
   0x9   :  { %p312_p4 = pnand %p311_p3, %p305_p0 }
   0xb   :  { %315 = shalt.err (!%p312_p4)
}
   0xc   :  { %s384_s17 = smov 128   ;;  %s385_s18 = smov 8  }
   0xd   :  { %34 = dma.hbm_to_vmem [thread:$0]  %s430_s1, 2048, %s29_s13, [#allocation6], %s384_s17, %s384_s17, %s385_s18  }
   0xe   :  { %s324_s21 = scalar_lea.vmem %s17_s15, 256  ;;  %p329_p6 = scmp.lt.s32.totalorder %s17_s15, %s17_s15 }
   0xf   :  { %p325_p5 = scmp.ne.s32.totalorder %s17_s15, %s324_s21  ;;  %p330_p7 = scmp.lt.s32.totalorder %s324_s21, %s324_s21 }
  0x11   :  { %p331_p8 = por %p330_p7, %p329_p6 }
  0x13   :  { %p332_p9 = pnand %p331_p8, %p325_p5 }
  0x15   :  { %335 = shalt.err (!%p332_p9)
}
  0x16   :  { %22 = dma.hbm_to_vmem [thread:$0]  %s429_s0, 256, %s17_s15, [#allocation3], %s384_s17, %s384_s17, %s385_s18  }
  0x17   :  { %s386_s24 = smov [#allocation7]  }
  0x18   :  { %s41_s25 = sshll.u32 %s386_s24, 4  ;;  %s42_s25 = int_to_ptr.vmem [resolvable:$true] %s41_s25 }
  0x19   :  { %s344_s26 = scalar_lea.vmem %s42_s25, 64  ;;  %p349_p11 = scmp.lt.s32.totalorder %s42_s25, %s42_s25 }
  0x1a   :  { %p345_p10 = scmp.ne.s32.totalorder %s42_s25, %s344_s26  ;;  %p350_p12 = scmp.lt.s32.totalorder %s344_s26, %s344_s26 }
  0x1c   :  { %p351_p13 = por %p350_p12, %p349_p11 }
  0x1e   :  { %p352_p0 = pnand %p351_p13, %p345_p10 }
  0x20   :  { %355 = shalt.err (!%p352_p0)
}
  0x21   :  { %44 = dma.hbm_to_vmem [thread:$0]  %s431_s2, 64, %s42_s25, [#allocation6]  }
  0x22   :  { %376 = dma.done.wait [#allocation3], 256  }
  0x23   :  { %377 = vsyncadd [#allocation3], 4294967040 }
  0x24   :  { %378 = dma.done.wait [#allocation6], 2112  }
  0x25   :  { %379 = vsyncadd [#allocation6], 4294965184  ;;  %v71_v0 = vld [vmem:[#allocation5 + $0x78] sm:$0xff]  ;;  %v70_v1 = vld [vmem:[#allocation5 + $0x70] sm:$0xff]  ;;  %s387_s0 = smov [#allocation8]  }
  0x26   :  { %247 = vmatprep.subr.mxu0 %v71_v0  ;;  %v69_v2 = vld [vmem:[#allocation5 + $0x68] sm:$0xff]  ;;  %v68_v3 = vld [vmem:[#allocation5 + $0x60] sm:$0xff]  ;;  %v54_v4 = vld [vmem:[#allocation2] sm:$0xff]  ;;  %s213_s2 = sshll.u32 %s387_s0, 4  ;;  %s214_s2 = int_to_ptr.vmem [resolvable:$true] %s213_s2 }
  0x27   :  { %248 = vmatpush3.msra.mxu0 %v71_v0  ;;  %v67_v5 = vld [vmem:[#allocation5 + $0x58] sm:$0xff]  ;;  %279 = vmatprep.mubr.f32.mxu0 %v54_v4  ;;  %v66_v6 = vld [vmem:[#allocation5 + $0x50] sm:$0xff]  ;;  %v65_v7 = vld [vmem:[#allocation5 + $0x48] sm:$0xff]  ;;  %s356_s28 = scalar_lea.vmem %s214_s2, 256  ;;  %p361_p2 = scmp.lt.s32.totalorder %s214_s2, %s214_s2 }
  0x28   :  { %249 = vmatprep.subr.mxu0 %v70_v1  ;;  %v64_v8 = vld [vmem:[#allocation5 + $0x40] sm:$0xff]  ;;  %v63_v9 = vld [vmem:[#allocation5 + $0x38] sm:$0xff]  ;;  %v62_v10 = vld [vmem:[#allocation5 + $0x30] sm:$0xff]  ;;  %p357_p1 = scmp.ne.s32.totalorder %s214_s2, %s356_s28  ;;  %p362_p3 = scmp.lt.s32.totalorder %s356_s28, %s356_s28 }
  0x29   :  { %250 = vmatpush3.msra.mxu0 %v70_v1  ;;  %v61_v11 = vld [vmem:[#allocation5 + $0x28] sm:$0xff]  ;;  %v60_v12 = vld [vmem:[#allocation5 + $0x20] sm:$0xff]  ;;  %v59_v13 = vld [vmem:[#allocation5 + $0x18] sm:$0xff] }
  0x2a   :  { %251 = vmatprep.subr.mxu0 %v69_v2  ;;  %v58_v14 = vld [vmem:[#allocation5 + $0x10] sm:$0xff]  ;;  %v57_v15 = vld [vmem:[#allocation5 + $0x8] sm:$0xff]  ;;  %v56_v16 = vld [vmem:[#allocation5] sm:$0xff]  ;;  %p363_p4 = por %p362_p3, %p361_p2 }
  0x2b   :  { %252 = vmatpush3.msra.mxu0 %v69_v2  ;;  %v55_v17 = vld [vmem:[#allocation2 + $0x8] sm:$0xff]  ;;  %v226_v19 = vld [vmem:[#allocation7] ss:$0 sm:$0xff]  ;;  %v227_v50 = vld [vmem:[#allocation7 + $0x1] ss:$0 sm:$0xff] }
  0x2c   :  { %253 = vmatprep.subr.mxu0 %v68_v3  ;;  %v228_v52 = vld [vmem:[#allocation7 + $0x2] ss:$0 sm:$0xff]  ;;  %p364_p5 = pnand %p363_p4, %p357_p1 }
  0x2d   :  { %254 = vmatpush3.msra.mxu0 %v68_v3 }
  0x2e   :  { %255 = vmatprep.subr.mxu0 %v67_v5 }
  0x2f   :  { %256 = vmatpush3.msra.mxu0 %v67_v5 }
  0x30   :  { %257 = vmatprep.subr.mxu0 %v66_v6 }
  0x31   :  { %258 = vmatpush3.msra.mxu0 %v66_v6 }
  0x32   :  { %259 = vmatprep.subr.mxu0 %v65_v7 }
  0x33   :  { %260 = vmatpush3.msra.mxu0 %v65_v7 }
  0x34   :  { %261 = vmatprep.subr.mxu0 %v64_v8 }
  0x35   :  { %262 = vmatpush3.msra.mxu0 %v64_v8 }
  0x36   :  { %263 = vmatprep.subr.mxu0 %v63_v9 }
  0x37   :  { %264 = vmatpush3.msra.mxu0 %v63_v9 }
  0x38   :  { %265 = vmatprep.subr.mxu0 %v62_v10 }
  0x39   :  { %266 = vmatpush3.msra.mxu0 %v62_v10 }
  0x3a   :  { %267 = vmatprep.subr.mxu0 %v61_v11 }
  0x3b   :  { %268 = vmatpush3.msra.mxu0 %v61_v11 }
  0x3c   :  { %269 = vmatprep.subr.mxu0 %v60_v12 }
  0x3d   :  { %270 = vmatpush3.msra.mxu0 %v60_v12 }
  0x3e   :  { %271 = vmatprep.subr.mxu0 %v59_v13 }
  0x3f   :  { %272 = vmatpush3.msra.mxu0 %v59_v13 }
  0x40   :  { %273 = vmatprep.subr.mxu0 %v58_v14 }
  0x41   :  { %274 = vmatpush3.msra.mxu0 %v58_v14 }
  0x42   :  { %275 = vmatprep.subr.mxu0 %v57_v15 }
  0x43   :  { %276 = vmatpush3.msra.mxu0 %v57_v15 }
  0x44   :  { %277 = vmatprep.subr.mxu0 %v56_v16 }
  0x45   :  { %278 = vmatpush3.msra.mxu0 %v56_v16 }
  0x46   :  { %280 = vmatmul.mubr.f32.vlgmr.msra.gmra.mxu0 %v55_v17 }
 0x106   :  { %v281_v18 = vpop.f32.mrf.mxu0 }
 0x107   :  { %v151_v22 = vadd.f32 %v281_v18, %v226_v19 }
 0x108   :  { %v145_v20 = vpop.f32.mrf.mxu0 }
 0x109   :  { %v146_v21 = vadd.f32 %v226_v19, %v145_v20  ;;  %v155_v24 = vadd.f32 %v151_v22, %v55_v17 }
 0x10b   :  { %v154_v23 = vadd.f32 %v146_v21, %v54_v4 }
 0x10d   :  { %156 = vadd.xlane.f32.xlu0 %v154_v23 }
 0x111   :  { %158 = vadd.xlane.f32.xlu0 %v155_v24 }
 0x196   :  { %v157_v25 = vpop.xlane.xlu0 %156 }
 0x197   :  { %v161_v26 = vmul.f32 0.0078125, %v157_v25 }
 0x199   :  { %v163_v27 = vsub.f32 %v154_v23, %v161_v26 }
 0x19a   :  { %v159_v28 = vpop.xlane.xlu0 %158 }
 0x19b   :  { %v162_v29 = vmul.f32 0.0078125, %v159_v28  ;;  %v165_v30 = vmul.f32 %v163_v27, %v163_v27 }
 0x19d   :  { %v164_v31 = vsub.f32 %v155_v24, %v162_v29  ;;  %167 = vadd.xlane.f32.xlu1 %v165_v30 }
 0x19f   :  { %v166_v32 = vmul.f32 %v164_v31, %v164_v31 }
 0x1a1   :  { %169 = vadd.xlane.f32.xlu1 %v166_v32 }
 0x226   :  { %v168_v33 = vpop.xlane.xlu1 %167 }
 0x227   :  { %v172_v34 = vmul.f32 0.007874016, %v168_v33 }
 0x229   :  { %288 = vrsqrt.f32 %v172_v34  ;;  %vm176_vm0 = vcmp.eq.f32.partialorder %v172_v34, inf  ;;  %v179_v39 = vand.u32 2147483648, %v172_v34  ;;  %vm178_vm1 = vcmp.eq.f32.partialorder %v172_v34, 0.0 }
 0x22a   :  { %v170_v35 = vpop.xlane.xlu1 %169 }
 0x22b   :  { %v173_v36 = vmul.f32 0.007874016, %v170_v35 }
 0x22d   :  { %290 = vrsqrt.f32 %v173_v36  ;;  %vm183_vm2 = vcmp.eq.f32.partialorder %v173_v36, inf  ;;  %v186_v45 = vand.u32 2147483648, %v173_v36  ;;  %vm185_vm3 = vcmp.eq.f32.partialorder %v173_v36, 0.0 }
 0x236   :  { %v289_v37 = vpop.eup %288 }
 0x237   :  { %v175_v38 = vmul.f32 %v289_v37, %v172_v34 }
 0x239   :  { %v177_v40 = vsel %vm176_vm0, %v172_v34, %v175_v38 }
 0x23a   :  { %v291_v41 = vpop.eup %290  ;;  %v180_v42 = vsel %vm178_vm1, %v179_v39, %v177_v40 }
 0x23b   :  { %v188_v43 = vadd.f32 1e-06, %v180_v42  ;;  %v182_v44 = vmul.f32 %v291_v41, %v173_v36 }
 0x23d   :  { %292 = vrcp.f32 %v188_v43  ;;  %v184_v46 = vsel %vm183_vm2, %v173_v36, %v182_v44 }
 0x23e   :  { %v187_v47 = vsel %vm185_vm3, %v186_v45, %v184_v46 }
 0x23f   :  { %v189_v48 = vadd.f32 1e-06, %v187_v47 }
 0x241   :  { %294 = vrcp.f32 %v189_v48 }
 0x24a   :  { %v293_v49 = vpop.eup %292 }
 0x24b   :  { %v192_v51 = vmul.f32 %v293_v49, %v163_v27 }
 0x24d   :  { %v198_v53 = vmul.f32 %v227_v50, %v192_v51 }
 0x24e   :  { %v295_v54 = vpop.eup %294 }
 0x24f   :  { %v193_v55 = vmul.f32 %v295_v54, %v164_v31  ;;  %v204_v56 = vadd.f32 %v228_v52, %v198_v53 }
 0x251   :  { %v199_v57 = vmul.f32 %v227_v50, %v193_v55  ;;  %206 = vst [vmem:[#allocation8] sm:$0xff] %v204_v56 }
 0x253   :  { %v205_v58 = vadd.f32 %v228_v52, %v199_v57 }
 0x255   :  { %207 = vst [vmem:[#allocation8 + $0x8] sm:$0xff] %v205_v58 }
 0x256   :  { %367 = shalt.err (!%p364_p5)
}
 0x257   :  { %219 = dma.vmem_to_hbm [thread:$0]  %s214_s2, 256, %s432_s3, [#allocation4], %s384_s17, %s384_s17, %s385_s18  }
 0x258   :  { %380 = dma.done.wait [#allocation4], 256  }
 0x259   :  { %381 = vsyncadd [#allocation4], 4294967040 }
 0x25a   :  { %223 = vsyncpa [#allocation3], 1 }
 0x25b   :  { %224 = vsyncpa [#allocation6], 1 }
 0x25c   :  { %225 = vsyncpa [#allocation4], 1 }

</bundles_post_ra>
